<compile_context>
chip_gen: v5e
topology: v5e:2x2
jax: 0.10.0
libtpu: 0.0.40
codegen_flags: <defaults>
</compile_context>

<pallas_src>
import functools

import jax
import jax.numpy as jnp
from jax.experimental import pallas as pl
from jax.experimental.pallas import tpu as pltpu


def _round_up(x, m):
    return ((x + m - 1) // m) * m


def _cconv1d_kernel(x_ref, wp_ref, wc_ref, b_ref, out_ref, carry_ref, *, t_tile):
    """One (batch, time-tile) block per grid step.

    x_ref    : (1, tt, C_in)       current time tile, channels-last
    wp_ref   : (C_in, C_out_p)     tap applied to x[t-1]  (PyTorch W[:, :, 0].T)
    wc_ref   : (C_in, C_out_p)     tap applied to x[t]    (PyTorch W[:, :, 1].T)
    b_ref    : (1, C_out_p)        bias (f32)
    out_ref  : (1, tt, C_out_p)
    carry_ref: (1, C_in) VMEM scratch — last input row of the previous time
               tile of the same batch (zeros at t == 0 => causal zero pad).
    """
    t = pl.program_id(1)

    @pl.when(t == 0)
    def _():
        carry_ref[...] = jnp.zeros_like(carry_ref)

    x_cur = x_ref[0]                                               # (tt, C_in)
    # x_prev[i] = x_cur[i-1]: sublane rotate on the XLU (no tile-sized copies),
    # then fix row 0 from the carried halo row with a single VPU select.
    x_shift = pltpu.roll(x_cur, shift=1, axis=0)                   # row 0 wraps
    row0 = jax.lax.broadcasted_iota(jnp.int32, x_cur.shape, 0) == 0
    x_prev = jnp.where(row0, carry_ref[...], x_shift)              # (tt, C_in)

    # Two lane-dense MXU matmuls, f32 accumulation, f32 bias epilogue.
    y = (jnp.dot(x_cur, wc_ref[...], preferred_element_type=jnp.float32)
         + jnp.dot(x_prev, wp_ref[...], preferred_element_type=jnp.float32)
         + b_ref[...])
    out_ref[0] = y.astype(out_ref.dtype)

    # Carry this tile's last row into the next time tile of the same batch.
    carry_ref[...] = x_cur[t_tile - 1:t_tile, :]


def _pick_time_tile(T, C_in, C_out_p, x_item, out_item, requested, budget_bytes):
    """Largest time tile (multiple of 8, <= requested) whose per-step VMEM
    working set fits the budget."""
    tt = max(8, min(_round_up(int(requested), 8), _round_up(T, 8)))

    def footprint(tt_):
        x_blk = tt_ * C_in * x_item            # input block
        o_blk = tt_ * C_out_p * out_item       # output block
        w = 2 * C_in * C_out_p * x_item        # both taps
        interm = tt_ * C_in * x_item + 2 * tt_ * C_out_p * 4   # x_prev + f32 y
        return 2 * x_blk + 2 * o_blk + 2 * w + interm          # double-buffered

    while tt > 8 and footprint(tt) > budget_bytes:
        tt = _round_up(tt // 2, 8)
    return tt, footprint(tt)


def cconv1d_btc(x_btc, weight, bias, *, time_tile=512, compute_dtype=None,
                out_dtype=None, vmem_budget_bytes=24 * 1024 * 1024,
                pad_out_lanes=True):
    """Causal Conv1d on channels-last input.

    x_btc : (B, T, C_in)
    weight: (C_out, C_in, 2)   -- PyTorch Conv1d weight layout
    bias  : (C_out,)
    Returns (B, T, C_out), channels-last, dtype = out_dtype (default x dtype).
    """
    B, T, C_in = x_btc.shape
    C_out = weight.shape[0]
    in_dtype = x_btc.dtype
    compute_dtype = in_dtype if compute_dtype is None else compute_dtype
    out_dtype = in_dtype if out_dtype is None else out_dtype

    # Lane-dense output: pad C_out up to a multiple of 128 (unmasked vst).
    C_out_p = _round_up(C_out, 128) if pad_out_lanes else C_out

    x_item = jnp.dtype(compute_dtype).itemsize
    out_item = jnp.dtype(out_dtype).itemsize
    tt, footprint = _pick_time_tile(T, C_in, C_out_p, x_item, out_item,
                                    time_tile, vmem_budget_bytes)
    T_pad = _round_up(T, tt)

    x_btc = x_btc.astype(compute_dtype)
    if T_pad != T:
        x_btc = jnp.pad(x_btc, ((0, 0), (0, T_pad - T), (0, 0)))

    # Split the two taps:  out[t] = x[t] @ w_cur + x[t-1] @ w_prev + b
    w_prev = jnp.transpose(weight[:, :, 0])                       # (C_in, C_out)
    w_cur = jnp.transpose(weight[:, :, 1])                        # (C_in, C_out)
    if C_out_p != C_out:
        pad_c = ((0, 0), (0, C_out_p - C_out))
        w_prev = jnp.pad(w_prev, pad_c)
        w_cur = jnp.pad(w_cur, pad_c)
        bias = jnp.pad(bias, (0, C_out_p - C_out))
    w_prev = w_prev.astype(compute_dtype)
    w_cur = w_cur.astype(compute_dtype)
    b2 = bias.reshape(1, C_out_p).astype(jnp.float32)

    kernel = functools.partial(_cconv1d_kernel, t_tile=tt)

    flops = 2 * B * T_pad * (2 * C_in) * C_out_p
    bytes_accessed = (B * T_pad * C_in * x_item
                      + 2 * C_in * C_out_p * x_item + C_out_p * 4
                      + B * T_pad * C_out_p * out_item)
    vmem_limit = int(min(48 * 1024 * 1024,
                         max(32 * 1024 * 1024, footprint + 8 * 1024 * 1024)))

    out = pl.pallas_call(
        kernel,
        out_shape=jax.ShapeDtypeStruct((B, T_pad, C_out_p), out_dtype),
        grid=(B, T_pad // tt),
        in_specs=[
            pl.BlockSpec((1, tt, C_in), lambda b, t: (b, t, 0)),        # x tile
            pl.BlockSpec((C_in, C_out_p), lambda b, t: (0, 0)),         # w_prev
            pl.BlockSpec((C_in, C_out_p), lambda b, t: (0, 0)),         # w_cur
            pl.BlockSpec((1, C_out_p), lambda b, t: (0, 0)),            # bias
        ],
        out_specs=pl.BlockSpec((1, tt, C_out_p), lambda b, t: (b, t, 0)),
        scratch_shapes=[pltpu.VMEM((1, C_in), compute_dtype)],          # halo carry
        compiler_params=pltpu.CompilerParams(
            # Time tiles carry a 1-row dependency -> sequential ("arbitrary");
            # batch is independent -> "parallel" (megacore / v7x 2-TC sharding).
            dimension_semantics=("parallel", "arbitrary"),
            vmem_limit_bytes=vmem_limit),
        cost_estimate=pl.CostEstimate(flops=flops, transcendentals=0,
                                      bytes_accessed=bytes_accessed),
    )(x_btc, w_prev, w_cur, b2)

    if T_pad != T or C_out_p != C_out:
        out = out[:, :T, :C_out]
    return out


def cconv1d(x_ncw, weight, bias, **kwargs):
    """PyTorch-layout wrapper: (B, C_in, T) -> (B, C_out, T)."""
    out_btc = cconv1d_btc(jnp.transpose(x_ncw, (0, 2, 1)), weight, bias, **kwargs)
    return jnp.transpose(out_btc, (0, 2, 1))


def _reference(x_ncw, weight, bias):
    """Pure-JAX reference mirroring the PyTorch forward (NCW layout)."""
    T = x_ncw.shape[2]
    x_prev = jnp.pad(x_ncw, ((0, 0), (0, 0), (1, 0)))[:, :, :T]   # x[t-1], 0 at t=0
    return (jnp.einsum("oc,bct->bot", weight[:, :, 0], x_prev)
            + jnp.einsum("oc,bct->bot", weight[:, :, 1], x_ncw)
            + bias[None, :, None])


if __name__ == "__main__":
    B, C_in, C_out, T = 2, 4, 8, 16

    key = jax.random.PRNGKey(0)
    k0, k1, k2, k3 = jax.random.split(key, 4)
    x = jax.random.normal(k0, (B, C_in, T), dtype=jnp.float32)
    weight = 0.3 * jax.random.normal(k1, (C_out, C_in, 2), dtype=jnp.float32)
    bias = 0.1 * jax.random.normal(k2, (C_out,), dtype=jnp.float32)

    ref = _reference(x, weight, bias)

    # Single time tile (tt == T), f32 operands, lane-padded C_out.
    out = cconv1d(x, weight, bias)
    jax.block_until_ready(out)
    assert out.shape == (B, C_out, T)
    assert jnp.allclose(out, ref, atol=1e-5, rtol=1e-5)

    # Multiple time tiles: exercises the cross-tile causal carry + pl.when reset.
    out_tiled = cconv1d(x, weight, bias, time_tile=8)
    jax.block_until_ready(out_tiled)
    assert jnp.allclose(out_tiled, ref, atol=1e-5, rtol=1e-5)

    # bf16 operands, f32 accumulation / output (HBM + MXU fast path).
    out_bf16 = cconv1d(x, weight, bias, compute_dtype=jnp.bfloat16)
    jax.block_until_ready(out_bf16)
    assert out_bf16.dtype == jnp.float32
    assert jnp.allclose(out_bf16, ref, atol=5e-2, rtol=5e-2)

    # Ragged T (not a multiple of the tile): exercises the trailing-pad path.
    T2 = 19
    x2 = jax.random.normal(k3, (B, C_in, T2), dtype=jnp.float32)
    out_rag = cconv1d(x2, weight, bias, time_tile=8)
    jax.block_until_ready(out_rag)
    assert out_rag.shape == (B, C_out, T2)
    assert jnp.allclose(out_rag, _reference(x2, weight, bias), atol=1e-5, rtol=1e-5)

    print("KERNEL_OK")
</pallas_src>

<mosaic_0001>
module attributes {stable_mosaic.version = 11 : i64} {
  func.func @_cconv1d_kernel(%arg0: i32, %arg1: i32, %arg2: memref<1x16x4xf32, #tpu.memory_space<vmem>>, %arg3: memref<4x128xf32, #tpu.memory_space<vmem>>, %arg4: memref<4x128xf32, #tpu.memory_space<vmem>>, %arg5: memref<1x128xf32, #tpu.memory_space<vmem>>, %arg6: memref<1x16x128xf32, #tpu.memory_space<vmem>>, %arg7: memref<1x4xf32, #tpu.memory_space<vmem>>) attributes {dimension_semantics = [#tpu.dimension_semantics<parallel>, #tpu.dimension_semantics<arbitrary>], iteration_bounds = array<i64: 2, 1>, scalar_prefetch = 0 : i64, scratch_operands = 1 : i64, tpu.core_type = #tpu.core_type<tc>, window_params = [{transform_indices = @transform_0, window_bounds = array<i64: 1, 16, 4>}, {pipeline_mode = #tpu.pipeline_mode<synchronous>, transform_indices = @transform_1, window_bounds = array<i64: 4, 128>}, {pipeline_mode = #tpu.pipeline_mode<synchronous>, transform_indices = @transform_2, window_bounds = array<i64: 4, 128>}, {pipeline_mode = #tpu.pipeline_mode<synchronous>, transform_indices = @transform_3, window_bounds = array<i64: 1, 128>}, {transform_indices = @transform_4, window_bounds = array<i64: 1, 16, 128>}]} {
    %c0_i32 = arith.constant 0 : i32
    %0 = arith.cmpi eq, %arg1, %c0_i32 : i32
    %1 = arith.extui %0 : i1 to i32
    %c0_i32_0 = arith.constant 0 : i32
    %2 = arith.cmpi ne, %1, %c0_i32_0 : i32
    scf.if %2 {
      %cst_18 = arith.constant 0.000000e+00 : f32
      %26 = vector.broadcast %cst_18 : f32 to vector<1x4xf32>
      %c0_19 = arith.constant 0 : index
      %c0_20 = arith.constant 0 : index
      %27 = vector.load %arg7[%c0_19, %c0_20] : memref<1x4xf32, #tpu.memory_space<vmem>>, vector<1x4xf32>
      tpu.vector_store %arg7[%c0_19, %c0_20], %26 {strides = array<i32>} : memref<1x4xf32, #tpu.memory_space<vmem>>, vector<1x4xf32>,
    } else {
    }
    %c0 = arith.constant 0 : index
    %c0_1 = arith.constant 0 : index
    %c0_2 = arith.constant 0 : index
    %3 = vector.load %arg2[%c0, %c0_1, %c0_2] : memref<1x16x4xf32, #tpu.memory_space<vmem>>, vector<1x16x4xf32>
    %4 = vector.shape_cast %3 : vector<1x16x4xf32> to vector<16x4xf32>
    %c1_i32 = arith.constant 1 : i32
    %5 = tpu.dynamic_rotate %4 by %c1_i32 dim 0 : vector<16x4xf32>, i32 -> vector<16x4xf32>
    %6 = tpu.iota {dimensions = array<i32: 0>} : vector<16x4xi32>
    %c0_i32_3 = arith.constant 0 : i32
    %7 = vector.broadcast %c0_i32_3 : i32 to vector<16x4xi32>
    %8 = arith.cmpi eq, %6, %7 : vector<16x4xi32>
    %c0_4 = arith.constant 0 : index
    %c0_5 = arith.constant 0 : index
    %9 = vector.load %arg7[%c0_4, %c0_5] : memref<1x4xf32, #tpu.memory_space<vmem>>, vector<1x4xf32>
    %10 = vector.shape_cast %9 : vector<1x4xf32> to vector<1x4xf32>
    %11 = vector.broadcast %10 : vector<1x4xf32> to vector<16x4xf32>
    %12 = arith.select %8, %11, %5 : vector<16x4xi1>, vector<16x4xf32>
    %c0_6 = arith.constant 0 : index
    %c0_7 = arith.constant 0 : index
    %13 = vector.load %arg4[%c0_6, %c0_7] : memref<4x128xf32, #tpu.memory_space<vmem>>, vector<4x128xf32>
    %cst = arith.constant dense<0.000000e+00> : vector<16x128xf32>
    %14 = tpu.matmul %4, %13, %cst {dimension_numbers = #tpu.dot_dimension_numbers<[1], [0], [0], [1], [0, 0, 1, 1], [], []>} : vector<16x4xf32>, vector<4x128xf32>, vector<16x128xf32> -> vector<16x128xf32>
    %c0_8 = arith.constant 0 : index
    %c0_9 = arith.constant 0 : index
    %15 = vector.load %arg3[%c0_8, %c0_9] : memref<4x128xf32, #tpu.memory_space<vmem>>, vector<4x128xf32>
    %cst_10 = arith.constant dense<0.000000e+00> : vector<16x128xf32>
    %16 = tpu.matmul %12, %15, %cst_10 {dimension_numbers = #tpu.dot_dimension_numbers<[1], [0], [0], [1], [0, 0, 1, 1], [], []>} : vector<16x4xf32>, vector<4x128xf32>, vector<16x128xf32> -> vector<16x128xf32>
    %17 = arith.addf %14, %16 : vector<16x128xf32>
    %c0_11 = arith.constant 0 : index
    %c0_12 = arith.constant 0 : index
    %18 = vector.load %arg5[%c0_11, %c0_12] : memref<1x128xf32, #tpu.memory_space<vmem>>, vector<1x128xf32>
    %19 = vector.broadcast %18 : vector<1x128xf32> to vector<16x128xf32>
    %20 = arith.addf %17, %19 : vector<16x128xf32>
    %c0_13 = arith.constant 0 : index
    %c0_14 = arith.constant 0 : index
    %c0_15 = arith.constant 0 : index
    %21 = vector.load %arg6[%c0_13, %c0_14, %c0_15] : memref<1x16x128xf32, #tpu.memory_space<vmem>>, vector<1x16x128xf32>
    %22 = vector.shape_cast %21 : vector<1x16x128xf32> to vector<16x128xf32>
    %23 = vector.shape_cast %20 : vector<16x128xf32> to vector<1x16x128xf32>
    tpu.vector_store %arg6[%c0_13, %c0_14, %c0_15], %23 {strides = array<i32>} : memref<1x16x128xf32, #tpu.memory_space<vmem>>, vector<1x16x128xf32>,
    %24 = vector.extract_strided_slice %4 {offsets = [15, 0], sizes = [1, 4], strides = [1, 1]} : vector<16x4xf32> to vector<1x4xf32>
    %c0_16 = arith.constant 0 : index
    %c0_17 = arith.constant 0 : index
    %25 = vector.load %arg7[%c0_16, %c0_17] : memref<1x4xf32, #tpu.memory_space<vmem>>, vector<1x4xf32>
    tpu.vector_store %arg7[%c0_16, %c0_17], %24 {strides = array<i32>} : memref<1x4xf32, #tpu.memory_space<vmem>>, vector<1x4xf32>,
    return
  }
  func.func @transform_0(%arg0: i32, %arg1: i32) -> (i32, i32, i32) {
    %c0_i32 = arith.constant 0 : i32
    %c0_i32_0 = arith.constant 0 : i32
    return %arg0, %arg1, %c0_i32 : i32, i32, i32
  }
  func.func @transform_1(%arg0: i32, %arg1: i32) -> (i32, i32) {
    %c0_i32 = arith.constant 0 : i32
    %c0_i32_0 = arith.constant 0 : i32
    %c0_i32_1 = arith.constant 0 : i32
    return %c0_i32, %c0_i32_0 : i32, i32
  }
  func.func @transform_2(%arg0: i32, %arg1: i32) -> (i32, i32) {
    %c0_i32 = arith.constant 0 : i32
    %c0_i32_0 = arith.constant 0 : i32
    %c0_i32_1 = arith.constant 0 : i32
    return %c0_i32, %c0_i32_0 : i32, i32
  }
  func.func @transform_3(%arg0: i32, %arg1: i32) -> (i32, i32) {
    %c0_i32 = arith.constant 0 : i32
    %c0_i32_0 = arith.constant 0 : i32
    %c0_i32_1 = arith.constant 0 : i32
    return %c0_i32, %c0_i32_0 : i32, i32
  }
  func.func @transform_4(%arg0: i32, %arg1: i32) -> (i32, i32, i32) {
    %c0_i32 = arith.constant 0 : i32
    %c0_i32_0 = arith.constant 0 : i32
    return %arg0, %arg1, %c0_i32 : i32, i32, i32
  }
}

</mosaic_0001>

<bundles_post_ra>
// kernel: tpu_custom_call.1
= control target key start
LH: loop header
LB: loop body
LE: loop exit
PB: predicated region body
PF: predicated region fallthrough
CT: control target
= control target key end

     0   :  { %9 = vsyncpa [#allocation4], 0  ;;  %s727_s0 = inlined_call_operand.vmem [shape: f32[2,16,4], index: 0, kind: input, shape index: {}]   ;;  %s728_s1 = inlined_call_operand.vmem [shape: f32[4,128], index: 1, kind: input, shape index: {}]   ;;  %s729_s2 = inlined_call_operand.vmem [shape: f32[4,128], index: 2, kind: input, shape index: {}]   ;;  %s730_s3 = inlined_call_operand.vmem [shape: f32[1,128], index: 3, kind: input, shape index: {}]   ;;  %s731_s4 = inlined_call_operand.hbm [shape: f32[2,16,128], index: 4, kind: output, shape index: {}]  }
   0x1   :  { %11 = vsyncpa [#allocation4 + $0x1], 0  ;;  %s617_s15 = smov 0   ;;  %s619_s16 = smov 0  }
   0x2   :  { %s621_s17 = smov 0   ;;  %s623_s18 = smov 0  }
   0x3   :  { %s625_s19 = smov 0   ;;  %s627_s20 = smov 0  }
   0x4 LB: > { %s426_s21 = sadd.s32 4294967295, %s587_s20   ;;  %s427_s22 = sadd.s32 4294967294, %s587_s20   ;;  %s587_s20 = sphi %s627_s20, %s17_s20   ;;  %s583_s19 = sphi %s625_s19, %s738_s19   ;;  %s579_s18 = sphi %s623_s18, %s737_s18   ;;  %s575_s17 = sphi %s621_s17, %s736_s17   ;;  %s571_s16 = sphi %s619_s16, %s735_s16   ;;  %s567_s15 = sphi %s617_s15, %s734_s15  }
   0x5   : > { %s29_s23 = sadd.s32 1, %s583_s19  ;;  %s129_s24 = sadd.s32 1, %s575_s17 }
   0x6   : > { %p31_p0 = scmp.ge.s32.totalorder %s29_s23, 2  ;;  %p139_p1 = scmp.ne.s32.totalorder %s575_s17, %s571_s16 }
   0x7   : > { %p140_p2 = scmp.eq.s32.totalorder %s426_s21, 1  ;;  %p145_p3 = scmp.ne.s32.totalorder %s571_s16, %s567_s15 }
   0x8   : > { %s740_s23 = smov (%p31_p0, %s29_s23), 0  ;;  %p146_p5 = scmp.eq.s32.totalorder %s427_s22, 1 }
   0x9   : > { %p657_p4 = por %p140_p2, %p139_p1  ;;  %s124_s26 = ssub.s32 %s583_s19, %s740_s23 }
   0xa   : > { %p430_p6 = scmp.ge.s32.totalorder %s587_s20, 1  ;;  %p127_p7 = scmp.eq.s32.totalorder %s124_s26, 0 }
   0xb   : > { %p664_p8 = por %p146_p5, %p145_p3  ;;  %p186_p9 = scmp.lt.s32.totalorder %s587_s20, 3 }
   0xc   : > { %s670_s28 = scalar_select %p127_p7, %s575_s17, %s129_s24  }
   0xd   : > { %p187_p10 = pnand %p430_p6, %p186_p9 }
   0xe   : > { %p217_p11 = scmp.lt.s32.totalorder (!%p187_p10), %s579_s18, 1  ;;  %s213_s12 = sand.u32 (!%p187_p10), 1, %s571_s16  }
   0xf   : > { %190 = sbr.rel (%p187_p10) target bundleno = 168 (0xa8), region = 36  ;;  %s431_s13 = sshll.u32 (!%p187_p10), %s213_s12, 4 }
  0x10   : > { %s446_s14 = sshll.u32 (!%p187_p10), %s579_s18, 4  ;;  %s215_s30 = scalar_lea.vmem (!%p187_p10), [#allocation3], %s431_s13 }
  0x11   : > { %s343_s29 = scalar_lea.hbm (!%p187_p10), %s731_s4, %s446_s14  ;;  %s344_s5 = sshll.u32 (!%p187_p10), %s215_s30, 4  ;;  %s345_s5 = int_to_ptr.vmem [resolvable:$true] %s344_s5 }
  0x12   : > { %s346_s6 = sshll.u32 (!%p187_p10), %s343_s29, 4  ;;  %s347_s6 = int_to_ptr.hbm [resolvable:$true] %s346_s6 }
  0x14   : > { %v252_v0 = vld [vmem:[%s728_s1] sm:$0xf]  ;;  %vm260_vm0 = vcmask 1043456   ;;  %v237_v2 = vlaneseq  ;;  %vm231_vm1 = vcmask 24576   ;;  %s218_s7 = scalar_select %p217_p11, %s579_s18, 1  ;;  %v589_v4 = vmov 0.0  }
  0x15   : > { %v251_v1 = vld [vmem:[%s729_s2] sm:$0xf]  ;;  %447 = vmatpush.msk.msra.mxu2 %vm260_vm0, %v252_v0  ;;  %434 = vmatpush.msk.msra.mxu0 %vm260_vm0, %v252_v0  ;;  %232 = vst.msk [vmem:[#allocation2] sm:$0x1] %vm231_vm1, %v589_v4  ;;  %vm253_vm2 = vcmask 31744   ;;  %vm327_vm4 = vcmask 31751  }
  0x16   : > { %448 = vmatpush.msk.msra.mxu3 %vm260_vm0, %v251_v1  ;;  %v238_v3 = vshrl.u32 %v237_v2, 7  ;;  %437 = vmatpush.msk.msra.mxu1 %vm260_vm0, %v251_v1  ;;  %s445_s8 = sshll.u32 %s218_s7, 4  ;;  %v508_v14 = vld [vmem:[%s730_s3] ss:$0 sm:$0xff]  ;;  %s330_s18 = scalar_lea.sflag [#allocation4], %s213_s12 }
  0x17   : > { %s224_s11 = scalar_lea.vmem %s727_s0, %s445_s8  ;;  %s523_s7 = sshra.s32 %s347_s6, 4  ;;  %s524_s7 = int_to_ptr.hbm [resolvable:$true] %s523_s7 }
  0x18   : > { %v233_v5 = vld [vmem:[%s224_s11] sm:$0xff]  ;;  %v234_v6 = vld [vmem:[%s224_s11 + $0x8] sm:$0xff]  ;;  %vm239_vm3 = vcmp.lt.s32.totalorder %v238_v3, 1  ;;  %vm243_vm5 = vcmp.eq.s32.totalorder %v238_v3, 0  ;;  %s525_s8 = scalar_lea.hbm %s524_s7, 16  ;;  %s529_s11 = scalar_lea.hbm %s731_s4, 32 }
  0x19   : > { %v235_v7 = vrot.slane %v233_v5, 7  ;;  %v236_v8 = vrot.slane %v234_v6, 7  ;;  %439 = vmatmul.msk.f32.vlgmr.msra.gmra.mxu3 %vm253_vm2, %v234_v6  ;;  %438 = vmatmul.msk.f32.vlgmr.msra.gmra.mxu1 %vm253_vm2, %v233_v5  ;;  %p526_p12 = scmp.ne.s32.totalorder %s524_s7, %s525_s8  ;;  %p530_p1 = scmp.lt.s32.totalorder %s524_s7, %s731_s4 }
  0x1a   : > { %p531_p2 = scmp.lt.s32.totalorder %s529_s11, %s525_s8 }
  0x1b   : > { %v240_v9 = vsel %vm239_vm3, %v235_v7, %v236_v8  ;;  %v241_v10 = vsel %vm239_vm3, %v236_v8, %v235_v7  ;;  %p527_p13 = pnand %p526_p12, %p657_p4 }
  0x1c   : > { %v507_v11 = vld [vmem:[#allocation2] ss:$0 sm:$0xff]  ;;  %436 = vmatmul.msk.f32.vlgmr.msra.gmra.mxu2 %vm253_vm2, %v240_v9  ;;  %p532_p3 = por %p531_p2, %p530_p1 }
  0x1d   : > { %328 = vst.msk [vmem:[#allocation2 - $0x7] sm:$0x80] %vm327_vm4, %v234_v6  ;;  %v249_v12 = vsel %vm243_vm5, %v507_v11, %v241_v10  ;;  %p528_p0 = pneg %p527_p13 }
  0x1e   : > { %435 = vmatmul.msk.f32.vlgmr.msra.gmra.mxu0 %vm253_vm2, %v249_v12 }
  0x1f   : > { %p533_p5 = pnand %p532_p3, %p528_p0 }
  0x96   : > { %v313_v13 = vpop.f32.mrf.mxu1 }
  0x9b   : > { %v281_v15 = vpop.f32.mrf.mxu0 }
  0x9c   : > { %v314_v16 = vadd.f32 %v313_v13, %v281_v15  ;;  %v316_v17 = vpop.f32.mrf.mxu3 }
  0x9e   : > { %v323_v18 = vadd.f32 %v508_v14, %v314_v16 }
  0x9f   : > { %v284_v19 = vpop.f32.mrf.mxu2 }
  0xa0   : > { %325 = vst [vmem:[%s215_s30] sm:$0xff] %v323_v18  ;;  %v317_v20 = vadd.f32 %v316_v17, %v284_v19 }
  0xa2   : > { %v324_v21 = vadd.f32 %v508_v14, %v317_v20 }
  0xa4   : > { %326 = vst [vmem:[%s215_s30 + $0x8] sm:$0xff] %v324_v21 }
  0xa5   : > { %536 = shalt.err (!%p533_p5)
}
  0xa6   : > { %s590_s12 = smov 128   ;;  %s591_s21 = smov 8  }
  0xa7   : > { %449 = dma.vmem_to_hbm [thread:$0]  (%p657_p4), %s345_s5, 256, %s347_s6, %s330_s18, %s590_s12, %s590_s12, %s591_s21  }
  0xa8 PF: > { %p455_p6 = scmp.ge.s32.totalorder %s587_s20, 2  ;;  %s361_s22 = sand.u32 1, %s567_s15  }
  0xa9   : > { %s362_s24 = scalar_lea.sflag [#allocation4], %s361_s22 }
  0xaa   : > { %p452_p7 = pnand %p455_p6, %p664_p8 }
  0xac   : > { %p453_p9 = pneg %p452_p7 }
  0xae   : > { %562 = dma.done.wait (%p453_p9), %s362_s24, 256  }
  0xaf   : > { %564 = vsyncadd (%p453_p9), %s362_s24, 4294967040  ;;  %s17_s20 = sadd.s32 1, %s587_s20   ;;  %s734_s15 = smov %s571_s16 }
  0xb0   : > { %p14_p10 = scmp.ge.s32.totalorder %s17_s20, 4   ;;  %s735_s16 = smov %s575_s17 }
  0xb1   : > { %s736_s17 = smov %s670_s28  ;;  %s737_s18 = smov %s583_s19 }
  0xb2   : > { %s738_s19 = smov %s740_s23  ;;  %16 = sbr.rel (!%p14_p10) target bundleno = 4 (0x4), region = 75 }
  0xb7   :  { %368 = vsyncpa [#allocation4], 1 }
  0xb8   :  { %370 = vsyncpa [#allocation4 + $0x1], 1 }

</bundles_post_ra>
